<compile_context>
chip_gen: v7x
topology: tpu7x:2x2x1
jax: 0.10.0
libtpu: 0.0.40
codegen_flags: <defaults>
</compile_context>

<pallas_src>
import functools
import math

import jax
import jax.numpy as jnp
from jax import lax
from jax.experimental import pallas as pl
from jax.experimental.pallas import tpu as pltpu


def _round_up(n, m):
    return ((n + m - 1) // m) * m


def _pos_enc_kernel(x_ref, pos_ref, pe_ref, o_ref, *, l_img):
    # x_ref:   (TILE_M, D)        float
    # pos_ref: (TILE_M, 2)        int32  (col 0 -> img row, col 1 -> seq row)
    # pe_ref:  (L_pad, D)         float  block-diagonal [[img_pe, 0], [0, seq_pe], [0,0]...]
    # o_ref:   (TILE_M, D)        float
    tm = x_ref.shape[0]
    l_pad = pe_ref.shape[0]

    idx_img = pos_ref[:, 0:1]              # (TILE_M, 1) int32, targets rows [0, l_img)
    idx_seq = pos_ref[:, 1:2] + l_img      # (TILE_M, 1) int32, targets rows [l_img, l_img+l_seq)

    # Two-hot row selector: one 1 in the img block and one 1 in the seq block
    # per row.  Gather-via-MXU in a single matmul producing the full (TM, D)
    # additive positional encoding (padded / out-of-range rows contribute 0).
    col = lax.broadcasted_iota(jnp.int32, (tm, l_pad), 1)
    sel = ((col == idx_img) | (col == idx_seq)).astype(pe_ref.dtype)

    pe_rows = jnp.dot(sel, pe_ref[...], preferred_element_type=jnp.float32)  # (TM, D)

    # Single full-width store.
    o_ref[...] = (x_ref[...] + pe_rows).astype(o_ref.dtype)
    # TODO(synk): dropout with p > 0.0 not implemented (module default p=0.0 -> identity).


def positional_encoding_forward(x, pos, img_pe, seq_pe, *, tile_m=None):
    """x: (B, T, D) float; pos: (B, T, 2) int; img_pe/seq_pe: (L, D//2) float."""
    B, T, D = x.shape
    half = D // 2
    assert img_pe.shape[1] == half and seq_pe.shape[1] == half

    l_img, l_seq = img_pe.shape[0], seq_pe.shape[0]
    l_total = l_img + l_seq
    # Pad the K (table-row / selector-lane) dimension to a multiple of 128 so
    # the selector is lane-aligned and the MXU K tiling is clean.
    l_pad = _round_up(l_total, 128)

    # Block-diagonal PE table: rows [0, l_img) carry img_pe in lanes [:half],
    # rows [l_img, l_total) carry seq_pe in lanes [half:]; rows [l_total, l_pad)
    # are zero padding.  One table, one (cached) DMA, one matmul per block.
    pe_full = jnp.zeros((l_pad, D), dtype=img_pe.dtype)
    pe_full = pe_full.at[:l_img, :half].set(img_pe)
    pe_full = pe_full.at[l_img:l_total, half:].set(seq_pe.astype(img_pe.dtype))

    # Flatten (B, T) -> M to maximize the matmul M dimension and amortize
    # per-grid-step overhead.
    M = B * T
    x2 = x.reshape(M, D)
    pos2 = pos.reshape(M, 2).astype(jnp.int32)

    if tile_m is None:
        # Big enough to feed the MXU, small enough that the (TILE_M, L_pad)
        # two-hot intermediate stays well within VMEM scratch.
        tile_m = min(_round_up(M, 8), 256)
    tile_m = _round_up(tile_m, 8)
    m_pad = _round_up(M, tile_m)
    if m_pad != M:
        x2 = jnp.pad(x2, ((0, m_pad - M), (0, 0)))
        pos2 = jnp.pad(pos2, ((0, m_pad - M), (0, 0)))  # index 0 is valid; rows discarded

    grid = (m_pad // tile_m,)
    kernel = functools.partial(_pos_enc_kernel, l_img=l_img)

    out = pl.pallas_call(
        kernel,
        out_shape=jax.ShapeDtypeStruct((m_pad, D), x.dtype),
        grid_spec=pltpu.PrefetchScalarGridSpec(
            num_scalar_prefetch=0,
            grid=grid,
            in_specs=[
                pl.BlockSpec((tile_m, D), lambda i: (i, 0)),     # x tile
                pl.BlockSpec((tile_m, 2), lambda i: (i, 0)),     # pos tile (one stream)
                pl.BlockSpec((l_pad, D), lambda i: (0, 0)),      # PE table, VMEM-resident
            ],
            out_specs=pl.BlockSpec((tile_m, D), lambda i: (i, 0)),
        ),
        compiler_params=pltpu.CompilerParams(
            dimension_semantics=("parallel",)),
    )(x2, pos2, pe_full)

    return out[:M].reshape(B, T, D)


def make_sinusoid_table(length, dim):
    """Matches the torch construction in PositionalEncoding.__init__."""
    position = jnp.arange(length, dtype=jnp.float32)[:, None]          # (L, 1)
    div_term = jnp.exp(jnp.arange(0, dim, 2, dtype=jnp.float32)
                       * (-math.log(10000.0) / dim))                   # (dim//2,)
    angles = position * div_term                                       # (L, dim//2)
    pe = jnp.zeros((length, dim), dtype=jnp.float32)
    pe = pe.at[:, 0::2].set(jnp.sin(angles))
    pe = pe.at[:, 1::2].set(jnp.cos(angles))
    return pe


if __name__ == "__main__":
    d_model = 32
    max_img_len = 32 * 32
    max_seq_len = 100
    B, T = 2, 8

    img_d = d_model // 2
    img_pe = make_sinusoid_table(max_img_len, img_d)
    # Reproduce the module exactly: register_buffer('seq_pe', img_pe) aliases
    # the img table for the sequence positions.
    seq_pe = img_pe

    key = jax.random.PRNGKey(0)
    kx, kp0, kp1 = jax.random.split(key, 3)
    x = jax.random.normal(kx, (B, T, d_model), dtype=jnp.float32)
    pos_img_idx = jax.random.randint(kp0, (B, T), 0, max_img_len)
    pos_seq_idx = jax.random.randint(kp1, (B, T), 0, max_seq_len)
    pos = jnp.stack([pos_img_idx, pos_seq_idx], axis=-1).astype(jnp.int32)

    out = positional_encoding_forward(x, pos, img_pe, seq_pe)
    out = jax.block_until_ready(out)

    # Pure-JAX reference of the torch forward (dropout p=0.0 -> identity).
    ref = x + jnp.concatenate(
        [img_pe[pos[:, :, 0]], seq_pe[pos[:, :, 1]]], axis=2)
    assert out.shape == (B, T, d_model) and out.dtype == x.dtype
    assert jnp.allclose(out, ref, atol=1e-5, rtol=1e-5)

    print("KERNEL_OK")
</pallas_src>

<mosaic_0001>
module attributes {stable_mosaic.version = 11 : i64} {
  func.func @_pos_enc_kernel(%arg0: i32, %arg1: memref<16x32xf32, #tpu.memory_space<vmem>>, %arg2: memref<16x2xi32, #tpu.memory_space<vmem>>, %arg3: memref<2048x32xf32, #tpu.memory_space<vmem>>, %arg4: memref<16x32xf32, #tpu.memory_space<vmem>>) attributes {dimension_semantics = [#tpu.dimension_semantics<parallel>], iteration_bounds = array<i64: 1>, scalar_prefetch = 0 : i64, scratch_operands = 0 : i64, tpu.core_type = #tpu.core_type<tc>, window_params = [{transform_indices = @transform_0, window_bounds = array<i64: 16, 32>}, {transform_indices = @transform_1, window_bounds = array<i64: 16, 2>}, {pipeline_mode = #tpu.pipeline_mode<synchronous>, transform_indices = @transform_2, window_bounds = array<i64: 2048, 32>}, {transform_indices = @transform_3, window_bounds = array<i64: 16, 32>}]} {
    %c0 = arith.constant 0 : index
    %c0_0 = arith.constant 0 : index
    %0 = vector.load %arg2[%c0, %c0_0] : memref<16x2xi32, #tpu.memory_space<vmem>>, vector<16x1xi32>
    %c0_1 = arith.constant 0 : index
    %c1 = arith.constant 1 : index
    %1 = vector.load %arg2[%c0_1, %c1] : memref<16x2xi32, #tpu.memory_space<vmem>>, vector<16x1xi32>
    %c1024_i32 = arith.constant 1024 : i32
    %2 = vector.broadcast %c1024_i32 : i32 to vector<16x1xi32>
    %3 = arith.addi %1, %2 : vector<16x1xi32>
    %4 = tpu.iota {dimensions = array<i32: 1>} : vector<16x2048xi32>
    %5 = vector.broadcast %0 : vector<16x1xi32> to vector<16x2048xi32>
    %6 = arith.cmpi eq, %4, %5 : vector<16x2048xi32>
    %7 = vector.broadcast %3 : vector<16x1xi32> to vector<16x2048xi32>
    %8 = arith.cmpi eq, %4, %7 : vector<16x2048xi32>
    %9 = arith.ori %6, %8 : vector<16x2048xi1>
    %10 = arith.extui %9 : vector<16x2048xi1> to vector<16x2048xi32>
    %11 = arith.sitofp %10 : vector<16x2048xi32> to vector<16x2048xf32>
    %c0_2 = arith.constant 0 : index
    %c0_3 = arith.constant 0 : index
    %12 = vector.load %arg3[%c0_2, %c0_3] : memref<2048x32xf32, #tpu.memory_space<vmem>>, vector<2048x32xf32>
    %cst = arith.constant dense<0.000000e+00> : vector<16x32xf32>
    %13 = tpu.matmul %11, %12, %cst {dimension_numbers = #tpu.dot_dimension_numbers<[1], [0], [0], [1], [0, 0, 1, 1], [], []>} : vector<16x2048xf32>, vector<2048x32xf32>, vector<16x32xf32> -> vector<16x32xf32>
    %c0_4 = arith.constant 0 : index
    %c0_5 = arith.constant 0 : index
    %14 = vector.load %arg1[%c0_4, %c0_5] : memref<16x32xf32, #tpu.memory_space<vmem>>, vector<16x32xf32>
    %15 = arith.addf %14, %13 : vector<16x32xf32>
    %c0_6 = arith.constant 0 : index
    %c0_7 = arith.constant 0 : index
    %16 = vector.load %arg4[%c0_6, %c0_7] : memref<16x32xf32, #tpu.memory_space<vmem>>, vector<16x32xf32>
    tpu.vector_store %arg4[%c0_6, %c0_7], %15 {strides = array<i32>} : memref<16x32xf32, #tpu.memory_space<vmem>>, vector<16x32xf32>,
    return
  }
  func.func @transform_0(%arg0: i32) -> (i32, i32) {
    %c0_i32 = arith.constant 0 : i32
    %c0_i32_0 = arith.constant 0 : i32
    return %arg0, %c0_i32 : i32, i32
  }
  func.func @transform_1(%arg0: i32) -> (i32, i32) {
    %c0_i32 = arith.constant 0 : i32
    %c0_i32_0 = arith.constant 0 : i32
    return %arg0, %c0_i32 : i32, i32
  }
  func.func @transform_2(%arg0: i32) -> (i32, i32) {
    %c0_i32 = arith.constant 0 : i32
    %c0_i32_0 = arith.constant 0 : i32
    %c0_i32_1 = arith.constant 0 : i32
    return %c0_i32, %c0_i32_0 : i32, i32
  }
  func.func @transform_3(%arg0: i32) -> (i32, i32) {
    %c0_i32 = arith.constant 0 : i32
    %c0_i32_0 = arith.constant 0 : i32
    return %arg0, %c0_i32 : i32, i32
  }
}

</mosaic_0001>

<bundles_post_ra>
// kernel: tpu_custom_call.1
= control target key start
LH: loop header
LB: loop body
LE: loop exit
PB: predicated region body
PF: predicated region fallthrough
CT: control target
= control target key end

     0   :  { %v1745_v3 = vmov 0   ;;  %v1746_v27 = vmov 1   ;;  %s2924_s0 = inlined_call_operand.vmem [shape: f32[16,32], index: 0, kind: input, shape index: {}]   ;;  %s2925_s1 = inlined_call_operand.vmem [shape: s32[16,2], index: 1, kind: input, shape index: {}]   ;;  %s2926_s2 = inlined_call_operand.vmem [shape: f32[2048,32], index: 2, kind: input, shape index: {}]   ;;  %s2927_s3 = inlined_call_operand.hbm [shape: f32[16,32], index: 3, kind: output, shape index: {}]  }
   0x1   :  { %v15_v0 = vld [vmem:[%s2925_s1] sm:$0xff]  ;;  %v16_v1 = vld [vmem:[%s2925_s1 + $0x8] sm:$0xff]  ;;  %1717 = vset.pattern.permute.xlu0 %v1745_v3  ;;  %1719 = vset.pattern.permute.xlu1 %v1745_v3  ;;  %v226_v16 = vld [vmem:[%s2926_s2 + $0x90] sm:$0xff] }
   0x2   :  { %v224_v2 = vld [vmem:[%s2926_s2 + $0x80] sm:$0xff]  ;;  %v225_v4 = vld [vmem:[%s2926_s2 + $0x88] sm:$0xff]  ;;  %37 = vperm.xlu0 %1717, %v15_v0   ;;  %40 = vperm.xlu1 %1719, %v16_v1   ;;  %v17_v12 = vadd.s32 1024, %v15_v0  ;;  %v18_v13 = vadd.s32 1024, %v16_v1  ;;  %v227_v17 = vld [vmem:[%s2926_s2 + $0x98] sm:$0xff] }
   0x3   :  { %v256_v5 = vld [vmem:[%s2926_s2 + $0x180] sm:$0xff]  ;;  %v257_v6 = vld [vmem:[%s2926_s2 + $0x188] sm:$0xff]  ;;  %v1455_v7 = vpack.c.bf16 %v225_v4, %v224_v2  ;;  %v1459_v19 = vpack.c.bf16 %v227_v17, %v226_v16  ;;  %v258_v20 = vld [vmem:[%s2926_s2 + $0x190] sm:$0xff] }
   0x4   :  { %v1487_v8 = vpack.c.bf16 %v257_v6, %v256_v5  ;;  %v208_v9 = vld [vmem:[%s2926_s2] sm:$0xff]  ;;  %v209_v10 = vld [vmem:[%s2926_s2 + $0x8] sm:$0xff]  ;;  %v259_v21 = vld [vmem:[%s2926_s2 + $0x198] sm:$0xff] }
   0x5   :  { %v240_v11 = vld [vmem:[%s2926_s2 + $0x100] sm:$0xff]  ;;  %v1457_v14 = vpack.c.bf16 %v209_v10, %v208_v9  ;;  %v241_v15 = vld [vmem:[%s2926_s2 + $0x108] sm:$0xff]  ;;  %1456 = vmatprep.subr.bf16.mxu0 %v1455_v7  ;;  %v210_v22 = vld [vmem:[%s2926_s2 + $0x10] sm:$0xff]  ;;  %v1491_v23 = vpack.c.bf16 %v259_v21, %v258_v20 }
   0x6   :  { %1488 = vmatprep.subr.bf16.mxu1 %v1487_v8  ;;  %v1489_v18 = vpack.c.bf16 %v241_v15, %v240_v11  ;;  %v211_v24 = vld [vmem:[%s2926_s2 + $0x18] sm:$0xff]  ;;  %v242_v25 = vld [vmem:[%s2926_s2 + $0x110] sm:$0xff]  ;;  %1718 = vset.pattern.permute.xlu0 %v1746_v27  ;;  %v228_v29 = vld [vmem:[%s2926_s2 + $0xa0] sm:$0xff] }
   0x7   :  { %1458 = vmatpush3.bf16.msra.mxu0 %v1457_v14  ;;  %v243_v26 = vld [vmem:[%s2926_s2 + $0x118] sm:$0xff]  ;;  %1720 = vset.pattern.permute.xlu1 %v1746_v27  ;;  %v1461_v28 = vpack.c.bf16 %v211_v24, %v210_v22  ;;  %v229_v30 = vld [vmem:[%s2926_s2 + $0xa8] sm:$0xff]  ;;  %v260_v31 = vld [vmem:[%s2926_s2 + $0x1a0] sm:$0xff] }
   0x8   :  { %75 = vperm.xlu0 %1718, %v17_v12   ;;  %78 = vperm.xlu1 %1720, %v18_v13   ;;  %v1463_v32 = vpack.c.bf16 %v229_v30, %v228_v29  ;;  %v261_v33 = vld [vmem:[%s2926_s2 + $0x1a8] sm:$0xff]  ;;  %v212_v34 = vld [vmem:[%s2926_s2 + $0x20] sm:$0xff]  ;;  %v1493_v36 = vpack.c.bf16 %v243_v26, %v242_v25  ;;  %v230_v38 = vld [vmem:[%s2926_s2 + $0xb0] sm:$0xff] }
   0x9   :  { %v213_v35 = vld [vmem:[%s2926_s2 + $0x28] sm:$0xff]  ;;  %1490 = vmatpush3.bf16.msra.mxu1 %v1489_v18  ;;  %1460 = vmatprep.subr.bf16.mxu0 %v1459_v19  ;;  %v244_v37 = vld [vmem:[%s2926_s2 + $0x120] sm:$0xff]  ;;  %v1495_v39 = vpack.c.bf16 %v261_v33, %v260_v31  ;;  %v231_v42 = vld [vmem:[%s2926_s2 + $0xb8] sm:$0xff] }
   0xa   :  { %1492 = vmatprep.subr.bf16.mxu1 %v1491_v23  ;;  %v1465_v40 = vpack.c.bf16 %v213_v35, %v212_v34  ;;  %v245_v41 = vld [vmem:[%s2926_s2 + $0x128] sm:$0xff]  ;;  %v262_v43 = vld [vmem:[%s2926_s2 + $0x1b0] sm:$0xff]  ;;  %v1467_v44 = vpack.c.bf16 %v231_v42, %v230_v38  ;;  %v263_v45 = vld [vmem:[%s2926_s2 + $0x1b8] sm:$0xff] }
   0xb   :  { %1462 = vmatpush3.bf16.msra.mxu0 %v1461_v28  ;;  %v214_v46 = vld [vmem:[%s2926_s2 + $0x30] sm:$0xff]  ;;  %v215_v47 = vld [vmem:[%s2926_s2 + $0x38] sm:$0xff]  ;;  %v232_v48 = vld [vmem:[%s2926_s2 + $0xc0] sm:$0xff]  ;;  %v1497_v50 = vpack.c.bf16 %v245_v41, %v244_v37  ;;  %v1499_v51 = vpack.c.bf16 %v263_v45, %v262_v43 }
   0xc   :  { %1464 = vmatprep.subr.bf16.mxu0 %v1463_v32  ;;  %v233_v49 = vld [vmem:[%s2926_s2 + $0xc8] sm:$0xff]  ;;  %v1469_v52 = vpack.c.bf16 %v215_v47, %v214_v46  ;;  %v246_v53 = vld [vmem:[%s2926_s2 + $0x130] sm:$0xff]  ;;  %v247_v54 = vld [vmem:[%s2926_s2 + $0x138] sm:$0xff] }
   0xd   :  { %1494 = vmatpush3.bf16.msra.mxu1 %v1493_v36  ;;  %v264_v55 = vld [vmem:[%s2926_s2 + $0x1c0] sm:$0xff]  ;;  %v1471_v56 = vpack.c.bf16 %v233_v49, %v232_v48  ;;  %v265_v57 = vld [vmem:[%s2926_s2 + $0x1c8] sm:$0xff]  ;;  %v234_v60 = vld [vmem:[%s2926_s2 + $0xd0] sm:$0xff]  ;;  %v1501_v62 = vpack.c.bf16 %v247_v54, %v246_v53 }
   0xe   :  { %1496 = vmatprep.subr.bf16.mxu1 %v1495_v39  ;;  %v216_v58 = vld [vmem:[%s2926_s2 + $0x40] sm:$0xff]  ;;  %v217_v59 = vld [vmem:[%s2926_s2 + $0x48] sm:$0xff]  ;;  %v235_v61 = vld [vmem:[%s2926_s2 + $0xd8] sm:$0xff]  ;;  %v1503_v63 = vpack.c.bf16 %v265_v57, %v264_v55 }
   0xf   :  { %1466 = vmatpush3.bf16.msra.mxu0 %v1465_v40  ;;  %v1473_v0 = vpack.c.bf16 %v217_v59, %v216_v58  ;;  %v248_v1 = vld [vmem:[%s2926_s2 + $0x140] sm:$0xff]  ;;  %v249_v2 = vld [vmem:[%s2926_s2 + $0x148] sm:$0xff]  ;;  %v266_v3 = vld [vmem:[%s2926_s2 + $0x1d0] sm:$0xff]  ;;  %v1475_v4 = vpack.c.bf16 %v235_v61, %v234_v60 }
  0x10   :  { %1468 = vmatprep.subr.bf16.mxu0 %v1467_v44  ;;  %v267_v5 = vld [vmem:[%s2926_s2 + $0x1d8] sm:$0xff]  ;;  %v218_v6 = vld [vmem:[%s2926_s2 + $0x50] sm:$0xff]  ;;  %v236_v8 = vld [vmem:[%s2926_s2 + $0xe0] sm:$0xff]  ;;  %v1505_v10 = vpack.c.bf16 %v249_v2, %v248_v1 }
  0x11   :  { %1498 = vmatpush3.bf16.msra.mxu1 %v1497_v50  ;;  %v219_v7 = vld [vmem:[%s2926_s2 + $0x58] sm:$0xff]  ;;  %v237_v9 = vld [vmem:[%s2926_s2 + $0xe8] sm:$0xff]  ;;  %v1507_v11 = vpack.c.bf16 %v267_v5, %v266_v3  ;;  %v250_v13 = vld [vmem:[%s2926_s2 + $0x150] sm:$0xff] }
  0x12   :  { %1500 = vmatprep.subr.bf16.mxu1 %v1499_v51  ;;  %v1477_v12 = vpack.c.bf16 %v219_v7, %v218_v6  ;;  %v251_v14 = vld [vmem:[%s2926_s2 + $0x158] sm:$0xff]  ;;  %v268_v15 = vld [vmem:[%s2926_s2 + $0x1e0] sm:$0xff]  ;;  %v1479_v16 = vpack.c.bf16 %v237_v9, %v236_v8  ;;  %v269_v17 = vld [vmem:[%s2926_s2 + $0x1e8] sm:$0xff] }
  0x13   :  { %1470 = vmatpush3.bf16.msra.mxu0 %v1469_v52  ;;  %v220_v18 = vld [vmem:[%s2926_s2 + $0x60] sm:$0xff]  ;;  %v221_v19 = vld [vmem:[%s2926_s2 + $0x68] sm:$0xff]  ;;  %v238_v20 = vld [vmem:[%s2926_s2 + $0xf0] sm:$0xff]  ;;  %v1509_v22 = vpack.c.bf16 %v251_v14, %v250_v13  ;;  %v1511_v23 = vpack.c.bf16 %v269_v17, %v268_v15 }
  0x14   :  { %1472 = vmatprep.subr.bf16.mxu0 %v1471_v56  ;;  %v239_v21 = vld [vmem:[%s2926_s2 + $0xf8] sm:$0xff]  ;;  %v1481_v24 = vpack.c.bf16 %v221_v19, %v220_v18  ;;  %v252_v25 = vld [vmem:[%s2926_s2 + $0x160] sm:$0xff]  ;;  %v253_v26 = vld [vmem:[%s2926_s2 + $0x168] sm:$0xff] }
  0x15   :  { %1502 = vmatpush3.bf16.msra.mxu1 %v1501_v62  ;;  %v270_v27 = vld [vmem:[%s2926_s2 + $0x1f0] sm:$0xff]  ;;  %v1483_v28 = vpack.c.bf16 %v239_v21, %v238_v20  ;;  %v271_v29 = vld [vmem:[%s2926_s2 + $0x1f8] sm:$0xff]  ;;  %v288_v32 = vld [vmem:[%s2926_s2 + $0x280] sm:$0xff]  ;;  %v1513_v34 = vpack.c.bf16 %v253_v26, %v252_v25 }
  0x16   :  { %1504 = vmatprep.subr.bf16.mxu1 %v1503_v63  ;;  %v222_v30 = vld [vmem:[%s2926_s2 + $0x70] sm:$0xff]  ;;  %v223_v31 = vld [vmem:[%s2926_s2 + $0x78] sm:$0xff]  ;;  %v289_v33 = vld [vmem:[%s2926_s2 + $0x288] sm:$0xff]  ;;  %v1515_v35 = vpack.c.bf16 %v271_v29, %v270_v27 }
  0x17   :  { %1474 = vmatpush3.bf16.msra.mxu0 %v1473_v0  ;;  %v1485_v36 = vpack.c.bf16 %v223_v31, %v222_v30  ;;  %v254_v37 = vld [vmem:[%s2926_s2 + $0x170] sm:$0xff]  ;;  %v255_v38 = vld [vmem:[%s2926_s2 + $0x178] sm:$0xff]  ;;  %v1519_v39 = vpack.c.bf16 %v289_v33, %v288_v32  ;;  %v320_v40 = vld [vmem:[%s2926_s2 + $0x380] sm:$0xff] }
  0x18   :  { %1476 = vmatprep.subr.bf16.mxu0 %v1475_v4  ;;  %v321_v41 = vld [vmem:[%s2926_s2 + $0x388] sm:$0xff]  ;;  %v1517_v42 = vpack.c.bf16 %v255_v38, %v254_v37 }
  0x19   :  { %1506 = vmatpush3.bf16.msra.mxu1 %v1505_v10  ;;  %v1551_v43 = vpack.c.bf16 %v321_v41, %v320_v40 }
  0x1a   :  { %1508 = vmatprep.subr.bf16.mxu1 %v1507_v11 }
  0x1b   :  { %1478 = vmatpush3.bf16.msra.mxu0 %v1477_v12 }
  0x1c   :  { %1480 = vmatprep.subr.bf16.mxu0 %v1479_v16 }
  0x1d   :  { %1510 = vmatpush3.bf16.msra.mxu1 %v1509_v22 }
  0x1e   :  { %1512 = vmatprep.subr.bf16.mxu1 %v1511_v23 }
  0x1f   :  { %1482 = vmatpush3.bf16.msra.mxu0 %v1481_v24 }
  0x20   :  { %1484 = vmatprep.subr.bf16.mxu0 %v1483_v28 }
  0x21   :  { %1514 = vmatpush3.bf16.msra.mxu1 %v1513_v34 }
  0x22   :  { %1516 = vmatprep.subr.bf16.mxu1 %v1515_v35 }
  0x23   :  { %1486 = vmatpush3.bf16.msra.mxu0 %v1485_v36 }
  0x24   :  { %1520 = vmatprep.subr.bf16.mxu0 %v1519_v39 }
  0x25   :  { %1518 = vmatpush3.bf16.msra.mxu1 %v1517_v42 }
  0x26   :  { %1552 = vmatprep.subr.bf16.mxu1 %v1551_v43 }
  0x27   :  { %8 = vsyncpa [#allocation3], 0  ;;  %v19_v44 = vlaneseq  ;;  %v272_v50 = vld [vmem:[%s2926_s2 + $0x200] sm:$0xff]  ;;  %v273_v51 = vld [vmem:[%s2926_s2 + $0x208] sm:$0xff]  ;;  %v1747_v0 = vmov 1.0   ;;  %s1748_s26 = smov [#allocation2]  }
  0x28   :  { %v304_v55 = vld [vmem:[%s2926_s2 + $0x300] sm:$0xff]  ;;  %v305_v56 = vld [vmem:[%s2926_s2 + $0x308] sm:$0xff]  ;;  %v290_v57 = vld [vmem:[%s2926_s2 + $0x290] sm:$0xff]  ;;  %v1521_v61 = vpack.c.bf16 %v273_v51, %v272_v50  ;;  %s1076_s27 = sshll.u32 %s1748_s26, 4  ;;  %s1077_s27 = int_to_ptr.vmem [resolvable:$true] %s1076_s27 }
  0x29   :  { %v1981_v45 = vand.u32 127, %v19_v44  ;;  %v291_v58 = vld [vmem:[%s2926_s2 + $0x298] sm:$0xff]  ;;  %v322_v59 = vld [vmem:[%s2926_s2 + $0x390] sm:$0xff]  ;;  %v1553_v1 = vpack.c.bf16 %v305_v56, %v304_v55  ;;  %v292_v5 = vld [vmem:[%s2926_s2 + $0x2a0] sm:$0xff]  ;;  %s1721_s28 = scalar_lea.vmem %s1077_s27, 256  ;;  %p1726_p1 = scmp.lt.s32.totalorder %s1077_s27, %s1077_s27 }
  0x2a   :  { %v323_v60 = vld [vmem:[%s2926_s2 + $0x398] sm:$0xff]  ;;  %v274_v62 = vld [vmem:[%s2926_s2 + $0x210] sm:$0xff]  ;;  %v1523_v4 = vpack.c.bf16 %v291_v58, %v290_v57  ;;  %v293_v6 = vld [vmem:[%s2926_s2 + $0x2a8] sm:$0xff]  ;;  %p1722_p0 = scmp.ne.s32.totalorder %s1077_s27, %s1721_s28  ;;  %p1727_p2 = scmp.lt.s32.totalorder %s1721_s28, %s1721_s28 }
  0x2b   :  { %v21_v48 = vadd.s32 128, %v1981_v45  ;;  %v23_v49 = vadd.s32 384, %v1981_v45  ;;  %v2000_v54 = vadd.s32 256, %v1981_v45  ;;  %v275_v63 = vld [vmem:[%s2926_s2 + $0x218] sm:$0xff]  ;;  %v306_v2 = vld [vmem:[%s2926_s2 + $0x310] sm:$0xff]  ;;  %v1555_v7 = vpack.c.bf16 %v323_v60, %v322_v59  ;;  %v324_v9 = vld [vmem:[%s2926_s2 + $0x3a0] sm:$0xff] }
  0x2c   :  { %v307_v3 = vld [vmem:[%s2926_s2 + $0x318] sm:$0xff]  ;;  %v2068_v8 = vadd.s32 640, %v1981_v45  ;;  %v325_v10 = vld [vmem:[%s2926_s2 + $0x3a8] sm:$0xff]  ;;  %v1525_v11 = vpack.c.bf16 %v275_v63, %v274_v62  ;;  %v2086_v12 = vadd.s32 896, %v1981_v45  ;;  %v276_v13 = vld [vmem:[%s2926_s2 + $0x220] sm:$0xff]  ;;  %v1527_v18 = vpack.c.bf16 %v293_v6, %v292_v5  ;;  %p1728_p3 = por %p1727_p2, %p1726_p1 }
  0x2d   :  { %v277_v14 = vld [vmem:[%s2926_s2 + $0x228] sm:$0xff]  ;;  %v1557_v15 = vpack.c.bf16 %v307_v3, %v306_v2  ;;  %v308_v16 = vld [vmem:[%s2926_s2 + $0x320] sm:$0xff]  ;;  %v294_v19 = vld [vmem:[%s2926_s2 + $0x2b0] sm:$0xff]  ;;  %v1559_v21 = vpack.c.bf16 %v325_v10, %v324_v9  ;;  %v30_v50 = vadd.s32 1280, %v1981_v45  ;;  %v2199_v55 = vadd.s32 1152, %v1981_v45 }
  0x2e   :  { %v309_v17 = vld [vmem:[%s2926_s2 + $0x328] sm:$0xff]  ;;  %v295_v20 = vld [vmem:[%s2926_s2 + $0x2b8] sm:$0xff]  ;;  %v326_v22 = vld [vmem:[%s2926_s2 + $0x3b0] sm:$0xff]  ;;  %v1529_v24 = vpack.c.bf16 %v277_v14, %v276_v13  ;;  %v2202_v56 = vadd.s32 1408, %v1981_v45  ;;  %p1729_p4 = pnand %p1728_p3, %p1722_p0 }
  0x2f   :  { %v327_v23 = vld [vmem:[%s2926_s2 + $0x3b8] sm:$0xff]  ;;  %v278_v25 = vld [vmem:[%s2926_s2 + $0x230] sm:$0xff]  ;;  %v1561_v26 = vpack.c.bf16 %v309_v17, %v308_v16  ;;  %v1531_v27 = vpack.c.bf16 %v295_v20, %v294_v19  ;;  %v296_v32 = vld [vmem:[%s2926_s2 + $0x2c0] sm:$0xff]  ;;  %v2282_v17 = vadd.s32 1920, %v1981_v45 }
  0x30   :  { %v279_v28 = vld [vmem:[%s2926_s2 + $0x238] sm:$0xff]  ;;  %v310_v29 = vld [vmem:[%s2926_s2 + $0x330] sm:$0xff]  ;;  %v1563_v30 = vpack.c.bf16 %v327_v23, %v326_v22  ;;  %v297_v33 = vld [vmem:[%s2926_s2 + $0x2c8] sm:$0xff]  ;;  %v32_v23 = vadd.s32 1536, %v1981_v45 }
  0x31   :  { %v311_v31 = vld [vmem:[%s2926_s2 + $0x338] sm:$0xff]  ;;  %v328_v34 = vld [vmem:[%s2926_s2 + $0x3c0] sm:$0xff]  ;;  %v329_v35 = vld [vmem:[%s2926_s2 + $0x3c8] sm:$0xff]  ;;  %v1533_v36 = vpack.c.bf16 %v279_v28, %v278_v25  ;;  %v1535_v41 = vpack.c.bf16 %v297_v33, %v296_v32 }
  0x32   :  { %v280_v37 = vld [vmem:[%s2926_s2 + $0x240] sm:$0xff]  ;;  %v281_v38 = vld [vmem:[%s2926_s2 + $0x248] sm:$0xff]  ;;  %v1565_v40 = vpack.c.bf16 %v311_v31, %v310_v29  ;;  %v298_v43 = vld [vmem:[%s2926_s2 + $0x2d0] sm:$0xff] }
  0x33   :  { %v312_v39 = vld [vmem:[%s2926_s2 + $0x340] sm:$0xff]  ;;  %v313_v42 = vld [vmem:[%s2926_s2 + $0x348] sm:$0xff]  ;;  %v299_v44 = vld [vmem:[%s2926_s2 + $0x2d8] sm:$0xff]  ;;  %v1537_v57 = vpack.c.bf16 %v281_v38, %v280_v37 }
  0x34   :  { %v330_v51 = vld [vmem:[%s2926_s2 + $0x3d0] sm:$0xff]  ;;  %v1569_v58 = vpack.c.bf16 %v313_v42, %v312_v39  ;;  %v1539_v59 = vpack.c.bf16 %v299_v44, %v298_v43  ;;  %v315_v63 = vld [vmem:[%s2926_s2 + $0x358] sm:$0xff]  ;;  %v301_v2 = vld [vmem:[%s2926_s2 + $0x2e8] sm:$0xff]  ;;  %v2944_v42 = vmov 0 }
  0x35   :  { %v282_v60 = vld [vmem:[%s2926_s2 + $0x250] sm:$0xff]  ;;  %v333_v5 = vld [vmem:[%s2926_s2 + $0x3e8] sm:$0xff]  ;;  %v316_v14 = vld [vmem:[%s2926_s2 + $0x360] sm:$0xff] }
  0x36   :  { %v314_v62 = vld [vmem:[%s2926_s2 + $0x350] sm:$0xff]  ;;  %v285_v9 = vld [vmem:[%s2926_s2 + $0x268] sm:$0xff]  ;;  %v335_v29 = vld [vmem:[%s2926_s2 + $0x3f8] sm:$0xff] }
  0x37   :  { %v302_v20 = vld [vmem:[%s2926_s2 + $0x2f0] sm:$0xff]  ;;  %v319_v37 = vld [vmem:[%s2926_s2 + $0x378] sm:$0xff]  ;;  %v384_v43 = vld [vmem:[%s2926_s2 + $0x580] sm:$0xff] }
  0x38   :  { %v334_v28 = vld [vmem:[%s2926_s2 + $0x3f0] sm:$0xff]  ;;  %v385_v44 = vld [vmem:[%s2926_s2 + $0x588] sm:$0xff]  ;;  %v452_v6 = vld [vmem:[%s2926_s2 + $0x7a0] sm:$0xff] }
  0x39   :  { %v286_v33 = vld [vmem:[%s2926_s2 + $0x270] sm:$0xff]  ;;  %v1579_v39 = vpack.c.bf16 %v335_v29, %v334_v28  ;;  %v372_v29 = vld [vmem:[%s2926_s2 + $0x520] sm:$0xff] }
  0x3a   :  { %v404_v16 = vld [vmem:[%s2926_s2 + $0x620] sm:$0xff]  ;;  %v454_v25 = vld [vmem:[%s2926_s2 + $0x7b0] sm:$0xff] }
  0x81   :  { %v1983_v46 = vpop.permute.xlu0 %37  ;;  %v1985_v47 = vpop.permute.xlu1 %40 }
  0x82   :  { %vm43_vm0 = vcmp.eq.s32.totalorder %v21_v48, %v1983_v46  ;;  %vm45_vm5 = vcmp.eq.s32.totalorder %v23_v49, %v1983_v46  ;;  %vm42_vm8 = vcmp.eq.s32.totalorder %v1981_v45, %v1983_v46  ;;  %vm59_vm9 = vcmp.eq.s32.totalorder %v21_v48, %v1985_v47 }
  0x83   :  { %vm44_vm12 = vcmp.eq.s32.totalorder %v2000_v54, %v1983_v46  ;;  %vm61_vm13 = vcmp.eq.s32.totalorder %v23_v49, %v1985_v47 }
  0x87   :  { %v1995_v52 = vpop.permute.xlu0 %75  ;;  %v1997_v53 = vpop.permute.xlu1 %78 }
  0x88   :  { %vm81_vm1 = vcmp.eq.s32.totalorder %v21_v48, %v1995_v52  ;;  %vm83_vm2 = vcmp.eq.s32.totalorder %v23_v49, %v1995_v52  ;;  %vm80_vm3 = vcmp.eq.s32.totalorder %v1981_v45, %v1995_v52  ;;  %vm82_vm6 = vcmp.eq.s32.totalorder %v2000_v54, %v1995_v52 }
  0x89   :  { %vm113_vm4 = vmor %vm43_vm0, %vm81_vm1  ;;  %vm97_vm10 = vcmp.eq.s32.totalorder %v21_v48, %v1997_v53  ;;  %vm99_vm14 = vcmp.eq.s32.totalorder %v23_v49, %v1997_v53  ;;  %vm58_vm0 = vcmp.eq.s32.totalorder %v1981_v45, %v1985_v47  ;;  %vm96_vm1 = vcmp.eq.s32.totalorder %v1981_v45, %v1997_v53 }
  0x8a   :  { %1119 = vmatprep.mubr.msk.f32.mxu0 %vm113_vm4, %v1747_v0  ;;  %vm115_vm7 = vmor %vm45_vm5, %vm83_vm2  ;;  %vm98_vm4 = vcmp.eq.s32.totalorder %v2000_v54, %v1997_v53  ;;  %v28_v48 = vadd.s32 1024, %v1981_v45  ;;  %v1567_v49 = vpack.c.bf16 %v329_v35, %v328_v34  ;;  %v287_v34 = vld [vmem:[%s2926_s2 + $0x278] sm:$0xff]  ;;  %v406_v35 = vld [vmem:[%s2926_s2 + $0x630] sm:$0xff] }
  0x8b   :  { %1123 = vmatprep.mubr.msk.f32.mxu1 %vm115_vm7, %v1747_v0  ;;  %vm112_vm11 = vmor %vm42_vm8, %vm80_vm3  ;;  %vm60_vm3 = vcmp.eq.s32.totalorder %v2000_v54, %v1985_v47  ;;  %vm87_vm8 = vcmp.eq.s32.totalorder %v2086_v12, %v1995_v52  ;;  %v331_v54 = vld [vmem:[%s2926_s2 + $0x3d8] sm:$0xff] }
  0x8c   :  { %1120 = vmatmul.mubr.msk.f32.vlgmr.msra.gmra.mrb[0].mxu0 %vm112_vm11, %v1747_v0  ;;  %vm114_vm15 = vmor %vm44_vm12, %vm82_vm6  ;;  %vm85_vm6 = vcmp.eq.s32.totalorder %v2068_v8, %v1995_v52  ;;  %vm49_vm12 = vcmp.eq.s32.totalorder %v2086_v12, %v1983_v46  ;;  %v1571_v3 = vpack.c.bf16 %v331_v54, %v330_v51  ;;  %v2949_v51 = vmov 0 }
  0x8d   :  { %1124 = vmatmul.mubr.msk.f32.vlgmr.msra.gmra.mrb[0].mxu1 %vm114_vm15, %v1747_v0  ;;  %1522 = vmatpush3.bf16.msra.mxu0 %v1521_v61  ;;  %vm129_vm2 = vmor %vm59_vm9, %vm97_vm10  ;;  %vm47_vm10 = vcmp.eq.s32.totalorder %v2068_v8, %v1983_v46  ;;  %v283_v61 = vld [vmem:[%s2926_s2 + $0x258] sm:$0xff]  ;;  %vm90_vm15 = vcmp.eq.s32.totalorder %v30_v50, %v1995_v52 }
  0x8e   :  { %1554 = vmatpush3.bf16.msra.mxu1 %v1553_v1  ;;  %1121 = vmatprep.mubr.msk.f32.mxu0 %vm129_vm2, %v1747_v0  ;;  %vm131_vm5 = vmor %vm61_vm13, %vm99_vm14  ;;  %vm88_vm14 = vcmp.eq.s32.totalorder %v28_v48, %v1995_v52  ;;  %v300_v1 = vld [vmem:[%s2926_s2 + $0x2e0] sm:$0xff]  ;;  %vm105_vm2 = vcmp.eq.s32.totalorder %v2199_v55, %v1997_v53  ;;  %v1541_v13 = vpack.c.bf16 %v283_v61, %v282_v60  ;;  %v337_v60 = vld [vmem:[%s2926_s2 + $0x408] sm:$0xff]  ;;  %v2953_v61 = vmov 0 }
  0x8f   :  { %1125 = vmatprep.mubr.msk.f32.mxu1 %vm131_vm5, %v1747_v0  ;;  %1524 = vmatprep.subr.bf16.mxu0 %v1523_v4  ;;  %vm128_vm7 = vmor %vm58_vm0, %vm96_vm1  ;;  %vm50_vm0 = vcmp.eq.s32.totalorder %v28_v48, %v1983_v46  ;;  %vm67_vm1 = vcmp.eq.s32.totalorder %v2199_v55, %v1985_v47  ;;  %v332_v4 = vld [vmem:[%s2926_s2 + $0x3e0] sm:$0xff]  ;;  %vm69_vm5 = vcmp.eq.s32.totalorder %v2202_v56, %v1985_v47 }
  0x90   :  { %1556 = vmatprep.subr.bf16.mxu1 %v1555_v7  ;;  %1122 = vmatmul.mubr.msk.f32.gmra.mrb[2].mxu0 %vm128_vm7, %v1747_v0  ;;  %vm130_vm9 = vmor %vm60_vm3, %vm98_vm4  ;;  %vm52_vm4 = vcmp.eq.s32.totalorder %v30_v50, %v1983_v46  ;;  %v2249_v7 = vld [vmem:[%s2926_s2 + $0x260] sm:$0xff]  ;;  %v1543_v19 = vpack.c.bf16 %v301_v2, %v300_v1  ;;  %v2955_v1 = vmov 0  ;;  %v354_v2 = vld [vmem:[%s2926_s2 + $0x490] sm:$0xff] }
  0x91   :  { %1126 = vmatmul.mubr.msk.f32.gmra.mrb[2].mxu1 %vm130_vm9, %v1747_v0  ;;  %1526 = vmatpush3.bf16.msra.mxu0 %v1525_v11  ;;  %vm117_vm11 = vmor %vm47_vm10, %vm85_vm6  ;;  %vm107_vm6 = vcmp.eq.s32.totalorder %v2202_v56, %v1997_v53  ;;  %vm104_vm9 = vcmp.eq.s32.totalorder %v28_v48, %v1997_v53  ;;  %v33_v11 = vadd.s32 1664, %v1981_v45 }
  0x92   :  { %1558 = vmatpush3.bf16.msra.mxu1 %v1557_v15  ;;  %1127 = vmatprep.mubr.msk.f32.mxu0 %vm117_vm11, %v1747_v0  ;;  %vm119_vm13 = vmor %vm49_vm12, %vm87_vm8  ;;  %vm66_vm8 = vcmp.eq.s32.totalorder %v28_v48, %v1985_v47  ;;  %v317_v15 = vld [vmem:[%s2926_s2 + $0x368] sm:$0xff]  ;;  %vm68_vm11 = vcmp.eq.s32.totalorder %v30_v50, %v1985_v47  ;;  %vm106_vm12 = vcmp.eq.s32.totalorder %v30_v50, %v1997_v53  ;;  %v24_v50 = vadd.s32 512, %v1981_v45 }
  0x93   :  { %1131 = vmatprep.mubr.msk.f32.mxu1 %vm119_vm13, %v1747_v0  ;;  %1528 = vmatprep.subr.bf16.mxu0 %v1527_v18  ;;  %vm2237_vm3 = vmor %vm50_vm0, %vm88_vm14  ;;  %v1573_v18 = vpack.c.bf16 %v315_v63, %v314_v62  ;;  %vm93_vm14 = vcmp.eq.s32.totalorder %v33_v11, %v1995_v52  ;;  %vm95_vm0 = vcmp.eq.s32.totalorder %v2282_v17, %v1995_v52  ;;  %v368_v62 = vld [vmem:[%s2926_s2 + $0x500] sm:$0xff]  ;;  %v369_v63 = vld [vmem:[%s2926_s2 + $0x508] sm:$0xff] }
  0x94   :  { %1560 = vmatprep.subr.bf16.mxu1 %v1559_v21  ;;  %vm2256_vm7 = vmor %vm52_vm4, %vm90_vm15  ;;  %v303_v21 = vld [vmem:[%s2926_s2 + $0x2f8] sm:$0xff]  ;;  %vm92_vm4 = vcmp.eq.s32.totalorder %v32_v23, %v1995_v52  ;;  %v1577_v31 = vpack.c.bf16 %v317_v15, %v316_v14  ;;  %v1617_v14 = vpack.c.bf16 %v369_v63, %v368_v62  ;;  %v377_v62 = vld [vmem:[%s2926_s2 + $0x548] sm:$0xff] }
  0x95   :  { %1530 = vmatpush3.bf16.msra.mxu0 %v1529_v24  ;;  %vm2275_vm10 = vmor %vm67_vm1, %vm105_vm2  ;;  %v1575_v24 = vpack.c.bf16 %v333_v5, %v332_v4  ;;  %vm55_vm2 = vcmp.eq.s32.totalorder %v33_v11, %v1983_v46  ;;  %v1547_v32 = vpack.c.bf16 %v303_v21, %v302_v20  ;;  %v2959_v4 = vmov 0  ;;  %v356_v20 = vld [vmem:[%s2926_s2 + $0x4a0] sm:$0xff]  ;;  %v357_v21 = vld [vmem:[%s2926_s2 + $0x4a8] sm:$0xff] }
  0x96   :  { %1562 = vmatpush3.bf16.msra.mxu1 %v1561_v26  ;;  %1532 = vmatprep.subr.bf16.mxu0 %v1531_v27  ;;  %vm2296_vm13 = vmor %vm69_vm5, %vm107_vm6  ;;  %v34_v26 = vadd.s32 1792, %v1981_v45  ;;  %v1545_v27 = vpack.c.bf16 %v285_v9, %v2249_v7  ;;  %vm57_vm6 = vcmp.eq.s32.totalorder %v2282_v17, %v1983_v46  ;;  %v386_v7 = vld [vmem:[%s2926_s2 + $0x590] sm:$0xff]  ;;  %v387_v9 = vld [vmem:[%s2926_s2 + $0x598] sm:$0xff]  ;;  %v1591_v28 = vpack.c.bf16 %v357_v21, %v356_v20 }
  0x97   :  { %1564 = vmatprep.subr.bf16.mxu1 %v1563_v30  ;;  %vm2306_vm15 = vmor %vm66_vm8, %vm104_vm9  ;;  %v362_v63 = vld [vmem:[%s2926_s2 + $0x4d0] sm:$0xff]  ;;  %v365_v20 = vld [vmem:[%s2926_s2 + $0x4e8] sm:$0xff] }
  0x98   :  { %vm2324_vm1 = vmor %vm68_vm11, %vm106_vm12  ;;  %vm94_vm8 = vcmp.eq.s32.totalorder %v34_v26, %v1995_v52  ;;  %vm54_vm11 = vcmp.eq.s32.totalorder %v32_v23, %v1983_v46  ;;  %vm2948_vm12 = vcmp.eq.s32.totalorder %v33_v11, %v1985_v47  ;;  %v396_v21 = vld [vmem:[%s2926_s2 + $0x5e0] sm:$0xff] }
  0x99   :  { %1534 = vmatpush3.bf16.msra.mxu0 %v1533_v36  ;;  %vm2338_vm5 = vmor %vm55_vm2, %vm93_vm14  ;;  %v318_v36 = vld [vmem:[%s2926_s2 + $0x370] sm:$0xff]  ;;  %vm109_vm14 = vcmp.eq.s32.totalorder %v33_v11, %v1997_v53  ;;  %vm56_vm2 = vcmp.eq.s32.totalorder %v34_v26, %v1983_v46 }
  0x9a   :  { %1566 = vmatpush3.bf16.msra.mxu1 %v1565_v40  ;;  %1536 = vmatprep.subr.bf16.mxu0 %v1535_v41  ;;  %vm2354_vm9 = vmor %vm57_vm6, %vm95_vm0  ;;  %v352_v40 = vld [vmem:[%s2926_s2 + $0x480] sm:$0xff]  ;;  %v353_v41 = vld [vmem:[%s2926_s2 + $0x488] sm:$0xff]  ;;  %vm108_vm6 = vcmp.eq.s32.totalorder %v32_v23, %v1997_v53  ;;  %v1581_v54 = vpack.c.bf16 %v319_v37, %v318_v36 }
  0x9b   :  { %1568 = vmatprep.subr.bf16.mxu1 %v1567_v49  ;;  %vm2369_vm0 = vmor %vm54_vm11, %vm92_vm4  ;;  %vm70_vm11 = vcmp.eq.s32.totalorder %v32_v23, %v1985_v47  ;;  %v1549_v49 = vpack.c.bf16 %v287_v34, %v286_v33  ;;  %v338_v11 = vld [vmem:[%s2926_s2 + $0x410] sm:$0xff]  ;;  %v389_v23 = vld [vmem:[%s2926_s2 + $0x5a8] sm:$0xff] }
  0x9c   :  { %v2945_v42 = vsel %vm2369_vm0, 4294967295, %v2944_v42  ;;  %vm2386_vm4 = vmor %vm56_vm2, %vm94_vm8  ;;  %vm2957_vm2 = vcmp.eq.s32.totalorder %v34_v26, %v1997_v53  ;;  %v374_v37 = vld [vmem:[%s2926_s2 + $0x530] sm:$0xff] }
  0x9d   :  { %1538 = vmatpush3.bf16.msra.mxu0 %v1537_v57  ;;  %vm2397_vm0 = vmor %vm2948_vm12, %vm109_vm14  ;;  %v26_v57 = vadd.s32 768, %v1981_v45  ;;  %vm2951_vm12 = vcmp.eq.s32.totalorder %v2282_v17, %v1997_v53  ;;  %vm2952_vm14 = vcmp.eq.s32.totalorder %v2282_v17, %v1985_v47  ;;  %v1615_v45 = vpack.c.bf16 %v385_v44, %v384_v43  ;;  %v370_v17 = vld [vmem:[%s2926_s2 + $0x510] sm:$0xff]  ;;  %v361_v43 = vld [vmem:[%s2926_s2 + $0x4c8] sm:$0xff] }
  0x9e   :  { %1570 = vmatpush3.bf16.msra.mxu1 %v1569_v58  ;;  %1540 = vmatprep.subr.bf16.mxu0 %v1539_v59  ;;  %v2950_v51 = vsel %vm2397_vm0, 4294967295, %v2949_v51  ;;  %v1583_v58 = vpack.c.bf16 %v353_v41, %v352_v40  ;;  %v336_v59 = vld [vmem:[%s2926_s2 + $0x400] sm:$0xff]  ;;  %vm2416_vm8 = vmor %vm2952_vm14, %vm2951_vm12  ;;  %v375_v40 = vld [vmem:[%s2926_s2 + $0x538] sm:$0xff] }
  0x9f   :  { %1572 = vmatprep.subr.bf16.mxu1 %v1571_v3  ;;  %v2954_v61 = vsel %vm2416_vm8, 4294967295, %v2953_v61  ;;  %vm2431_vm12 = vmor %vm70_vm11, %vm108_vm6  ;;  %v355_v3 = vld [vmem:[%s2926_s2 + $0x498] sm:$0xff]  ;;  %vm2958_vm8 = vcmp.eq.s32.totalorder %v34_v26, %v1985_v47  ;;  %vm46_vm6 = vcmp.eq.s32.totalorder %v24_v50, %v1983_v46  ;;  %v1585_v5 = vpack.c.bf16 %v337_v60, %v336_v59  ;;  %v341_v26 = vld [vmem:[%s2926_s2 + $0x428] sm:$0xff] }
  0xa0   :  { %v2956_v1 = vsel %vm2431_vm12, 4294967295, %v2955_v1  ;;  %vm2446_vm0 = vmor %vm2958_vm8, %vm2957_vm2  ;;  %vm2961_vm8 = vcmp.eq.s32.totalorder %v24_v50, %v1995_v52  ;;  %vm2962_vm12 = vcmp.eq.s32.totalorder %v26_v57, %v1995_v52  ;;  %v1587_v15 = vpack.c.bf16 %v355_v3, %v354_v2  ;;  %v360_v41 = vld [vmem:[%s2926_s2 + $0x4c0] sm:$0xff]  ;;  %v345_v59 = vld [vmem:[%s2926_s2 + $0x448] sm:$0xff] }
  0xa1   :  { %1542 = vmatpush3.bf16.msra.mxu0 %v1541_v13  ;;  %v2960_v4 = vsel %vm2446_vm0, 4294967295, %v2959_v4  ;;  %vm116_vm2 = vmor %vm46_vm6, %vm2961_vm8  ;;  %vm48_vm0 = vcmp.eq.s32.totalorder %v26_v57, %v1983_v46  ;;  %v339_v13 = vld [vmem:[%s2926_s2 + $0x418] sm:$0xff]  ;;  %v392_v44 = vld [vmem:[%s2926_s2 + $0x5c0] sm:$0xff] }
  0xa2   :  { %1574 = vmatpush3.bf16.msra.mxu1 %v1573_v18  ;;  %1544 = vmatprep.subr.bf16.mxu0 %v1543_v19  ;;  %vm118_vm6 = vmor %vm48_vm0, %vm2962_vm12  ;;  %v371_v18 = vld [vmem:[%s2926_s2 + $0x518] sm:$0xff]  ;;  %vm2963_vm0 = vcmp.eq.s32.totalorder %v2068_v8, %v1997_v53  ;;  %vm2964_vm12 = vcmp.eq.s32.totalorder %v2068_v8, %v1985_v47  ;;  %v1619_v19 = vpack.c.bf16 %v387_v9, %v386_v7  ;;  %v388_v8 = vld [vmem:[%s2926_s2 + $0x5a0] sm:$0xff] }
  0xa3   :  { %1576 = vmatprep.subr.bf16.mxu1 %v1575_v24  ;;  %vm133_vm8 = vmor %vm2964_vm12, %vm2963_vm0  ;;  %vm2966_vm0 = vcmp.eq.s32.totalorder %v2086_v12, %v1985_v47  ;;  %v340_v24 = vld [vmem:[%s2926_s2 + $0x420] sm:$0xff]  ;;  %v363_v2 = vld [vmem:[%s2926_s2 + $0x4d8] sm:$0xff] }
  0xa4   :  { %v1593_v33 = vpack.c.bf16 %v341_v26, %v340_v24  ;;  %v376_v60 = vld [vmem:[%s2926_s2 + $0x540] sm:$0xff]  ;;  %v394_v3 = vld [vmem:[%s2926_s2 + $0x5d0] sm:$0xff] }
  0xa5   :  { %1546 = vmatpush3.bf16.msra.mxu0 %v1545_v27  ;;  %v1621_v27 = vpack.c.bf16 %v371_v18, %v370_v17  ;;  %v1633_v9 = vpack.c.bf16 %v377_v62, %v376_v60  ;;  %v379_v18 = vld [vmem:[%s2926_s2 + $0x558] sm:$0xff]  ;;  %v348_v26 = vld [vmem:[%s2926_s2 + $0x460] sm:$0xff]  ;;  %v418_v62 = vld [vmem:[%s2926_s2 + $0x690] sm:$0xff] }
  0xa6   :  { %1578 = vmatpush3.bf16.msra.mxu1 %v1577_v31  ;;  %1548 = vmatprep.subr.bf16.mxu0 %v1547_v32  ;;  %v373_v31 = vld [vmem:[%s2926_s2 + $0x528] sm:$0xff]  ;;  %v359_v32 = vld [vmem:[%s2926_s2 + $0x4b8] sm:$0xff]  ;;  %v432_v60 = vld [vmem:[%s2926_s2 + $0x700] sm:$0xff] }
  0xa7   :  { %1580 = vmatprep.subr.bf16.mxu1 %v1579_v39  ;;  %v1625_v34 = vpack.c.bf16 %v373_v31, %v372_v29  ;;  %v381_v31 = vld [vmem:[%s2926_s2 + $0x568] sm:$0xff] }
  0xa9   :  { %1550 = vmatpush3.bf16.msra.mxu0 %v1549_v49  ;;  %v393_v49 = vld [vmem:[%s2926_s2 + $0x5c8] sm:$0xff] }
  0xaa   :  { %1582 = vmatpush3.bf16.msra.mxu1 %v1581_v54  ;;  %1584 = vmatprep.subr.bf16.mxu0 %v1583_v58  ;;  %v1629_v54 = vpack.c.bf16 %v375_v40, %v374_v37  ;;  %v344_v58 = vld [vmem:[%s2926_s2 + $0x440] sm:$0xff] }
  0xab   :  { %1616 = vmatprep.subr.bf16.mxu1 %v1615_v45  ;;  %v1631_v45 = vpack.c.bf16 %v393_v49, %v392_v44  ;;  %v1601_v7 = vpack.c.bf16 %v345_v59, %v344_v58  ;;  %v416_v40 = vld [vmem:[%s2926_s2 + $0x680] sm:$0xff]  ;;  %v449_v44 = vld [vmem:[%s2926_s2 + $0x788] sm:$0xff] }
  0xac   :  { %1128 = vmatmul.mubr.msk.f32.vlgmr.msra.gmra.mrb[4].mxu0 %vm116_vm2, %v1747_v0  ;;  %vm2965_vm2 = vcmp.eq.s32.totalorder %v2086_v12, %v1997_v53  ;;  %v1589_v12 = vpack.c.bf16 %v339_v13, %v338_v11  ;;  %v1603_v11 = vpack.c.bf16 %v363_v2, %v362_v63  ;;  %v346_v13 = vld [vmem:[%s2926_s2 + $0x450] sm:$0xff]  ;;  %v400_v58 = vld [vmem:[%s2926_s2 + $0x600] sm:$0xff]  ;;  %v401_v59 = vld [vmem:[%s2926_s2 + $0x608] sm:$0xff] }
  0xad   :  { %1132 = vmatmul.mubr.msk.f32.vlgmr.msra.gmra.mrb[4].mxu1 %vm118_vm6, %v1747_v0  ;;  %1129 = vmatprep.mubr.msk.f32.mxu0 %vm133_vm8, %v1747_v0  ;;  %vm135_vm12 = vmor %vm2966_vm0, %vm2965_vm2  ;;  %vm2967_vm6 = vcmp.eq.s32.totalorder %v24_v50, %v1997_v53  ;;  %vm2968_vm8 = vcmp.eq.s32.totalorder %v24_v50, %v1985_v47  ;;  %vm91_vm2 = vcmp.eq.s32.totalorder %v2202_v56, %v1995_v52  ;;  %v419_v63 = vld [vmem:[%s2926_s2 + $0x698] sm:$0xff]  ;;  %v450_v2 = vld [vmem:[%s2926_s2 + $0x790] sm:$0xff] }
  0xae   :  { %1133 = vmatprep.mubr.msk.f32.mxu1 %vm135_vm12, %v1747_v0  ;;  %1586 = vmatpush3.bf16.msra.mxu0 %v1585_v5  ;;  %vm132_vm14 = vmor %vm2968_vm8, %vm2967_vm6  ;;  %vm2969_vm0 = vcmp.eq.s32.totalorder %v26_v57, %v1997_v53  ;;  %vm2970_vm12 = vcmp.eq.s32.totalorder %v26_v57, %v1985_v47  ;;  %vm51_vm6 = vcmp.eq.s32.totalorder %v2199_v55, %v1983_v46  ;;  %v358_v53 = vld [vmem:[%s2926_s2 + $0x4b0] sm:$0xff]  ;;  %v395_v5 = vld [vmem:[%s2926_s2 + $0x5d8] sm:$0xff] }
  0xaf   :  { %1618 = vmatpush3.bf16.msra.mxu1 %v1617_v14  ;;  %vm134_vm11 = vmor %vm2970_vm12, %vm2969_vm0  ;;  %1588 = vmatprep.subr.bf16.mxu0 %v1587_v15  ;;  %vm2971_vm8 = vcmp.eq.s32.totalorder %v2199_v55, %v1995_v52  ;;  %vm53_vm12 = vcmp.eq.s32.totalorder %v2202_v56, %v1983_v46  ;;  %v1623_v47 = vpack.c.bf16 %v389_v23, %v388_v8  ;;  %v390_v46 = vld [vmem:[%s2926_s2 + $0x5b0] sm:$0xff]  ;;  %v391_v55 = vld [vmem:[%s2926_s2 + $0x5b8] sm:$0xff] }
  0xb0   :  { %1130 = vmatmul.mubr.msk.f32.gmra.mrb[6].mxu0 %vm132_vm14, %v1747_v0  ;;  %1620 = vmatprep.subr.bf16.mxu1 %v1619_v19  ;;  %vm121_vm0 = vmor %vm51_vm6, %vm2971_vm8  ;;  %v1595_v36 = vpack.c.bf16 %v359_v32, %v358_v53  ;;  %v342_v52 = vld [vmem:[%s2926_s2 + $0x430] sm:$0xff]  ;;  %v343_v56 = vld [vmem:[%s2926_s2 + $0x438] sm:$0xff]  ;;  %v1627_v39 = vpack.c.bf16 %v391_v55, %v390_v46  ;;  %v1599_v57 = vpack.c.bf16 %v361_v43, %v360_v41 }
  0xb1   :  { %1134 = vmatmul.mubr.msk.f32.gmra.mrb[6].mxu1 %vm134_vm11, %v1747_v0  ;;  %1135 = vmatprep.mubr.msk.f32.mxu0 %vm121_vm0, %v1747_v0  ;;  %vm123_vm14 = vmor %vm53_vm12, %vm91_vm2  ;;  %v1597_v50 = vpack.c.bf16 %v343_v56, %v342_v52  ;;  %v347_v14 = vld [vmem:[%s2926_s2 + $0x458] sm:$0xff]  ;;  %v378_v15 = vld [vmem:[%s2926_s2 + $0x550] sm:$0xff]  ;;  %v1635_v17 = vpack.c.bf16 %v395_v5, %v394_v3  ;;  %v1649_v5 = vpack.c.bf16 %v401_v59, %v400_v58 }
  0xb2   :  { %1590 = vmatpush3.bf16.msra.mxu0 %v1589_v12  ;;  %1139 = vmatprep.mubr.msk.f32.mxu1 %vm123_vm14, %v1747_v0  ;;  %v364_v19 = vld [vmem:[%s2926_s2 + $0x4e0] sm:$0xff]  ;;  %v397_v8 = vld [vmem:[%s2926_s2 + $0x5e8] sm:$0xff]  ;;  %v1605_v23 = vpack.c.bf16 %v347_v14, %v346_v13  ;;  %v1637_v12 = vpack.c.bf16 %v379_v18, %v378_v15  ;;  %v367_v53 = vld [vmem:[%s2926_s2 + $0x4f8] sm:$0xff] }
  0xb3   :  { %1622 = vmatpush3.bf16.msra.mxu1 %v1621_v27  ;;  %1592 = vmatprep.subr.bf16.mxu0 %v1591_v28  ;;  %v1607_v24 = vpack.c.bf16 %v365_v20, %v364_v19  ;;  %v349_v27 = vld [vmem:[%s2926_s2 + $0x468] sm:$0xff]  ;;  %v380_v28 = vld [vmem:[%s2926_s2 + $0x560] sm:$0xff]  ;;  %v1639_v29 = vpack.c.bf16 %v397_v8, %v396_v21  ;;  %v398_v32 = vld [vmem:[%s2926_s2 + $0x5f0] sm:$0xff] }
  0xb4   :  { %1624 = vmatprep.subr.bf16.mxu1 %v1623_v47  ;;  %v366_v47 = vld [vmem:[%s2926_s2 + $0x4f0] sm:$0xff]  ;;  %v399_v46 = vld [vmem:[%s2926_s2 + $0x5f8] sm:$0xff]  ;;  %v1609_v55 = vpack.c.bf16 %v349_v27, %v348_v26  ;;  %v417_v41 = vld [vmem:[%s2926_s2 + $0x688] sm:$0xff] }
  0xb5   :  { %v351_v52 = vld [vmem:[%s2926_s2 + $0x478] sm:$0xff]  ;;  %v382_v56 = vld [vmem:[%s2926_s2 + $0x570] sm:$0xff]  ;;  %v1643_v37 = vpack.c.bf16 %v399_v46, %v398_v32  ;;  %v448_v43 = vld [vmem:[%s2926_s2 + $0x780] sm:$0xff] }
  0xb6   :  { %1594 = vmatpush3.bf16.msra.mxu0 %v1593_v33  ;;  %v1641_v33 = vpack.c.bf16 %v381_v31, %v380_v28  ;;  %v451_v3 = vld [vmem:[%s2926_s2 + $0x798] sm:$0xff]  ;;  %v434_v14 = vld [vmem:[%s2926_s2 + $0x710] sm:$0xff]  ;;  %v420_v18 = vld [vmem:[%s2926_s2 + $0x6a0] sm:$0xff] }
  0xb7   :  { %1626 = vmatpush3.bf16.msra.mxu1 %v1625_v34  ;;  %1596 = vmatprep.subr.bf16.mxu0 %v1595_v36  ;;  %v1611_v34 = vpack.c.bf16 %v367_v53, %v366_v47  ;;  %v350_v36 = vld [vmem:[%s2926_s2 + $0x470] sm:$0xff]  ;;  %v403_v13 = vld [vmem:[%s2926_s2 + $0x618] sm:$0xff]  ;;  %v1683_v15 = vpack.c.bf16 %v451_v3, %v450_v2  ;;  %v421_v19 = vld [vmem:[%s2926_s2 + $0x6a8] sm:$0xff] }
  0xb8   :  { %1628 = vmatprep.subr.bf16.mxu1 %v1627_v39  ;;  %v383_v39 = vld [vmem:[%s2926_s2 + $0x578] sm:$0xff]  ;;  %v1613_v49 = vpack.c.bf16 %v351_v52, %v350_v36  ;;  %v453_v20 = vld [vmem:[%s2926_s2 + $0x7a8] sm:$0xff]  ;;  %v1655_v8 = vpack.c.bf16 %v421_v19, %v420_v18  ;;  %v422_v26 = vld [vmem:[%s2926_s2 + $0x6b0] sm:$0xff] }
  0xb9   :  { %v1687_v22 = vpack.c.bf16 %v453_v20, %v452_v6  ;;  %v423_v27 = vld [vmem:[%s2926_s2 + $0x6b8] sm:$0xff]  ;;  %v438_v53 = vld [vmem:[%s2926_s2 + $0x730] sm:$0xff]  ;;  %v424_v46 = vld [vmem:[%s2926_s2 + $0x6c0] sm:$0xff] }
  0xba   :  { %1598 = vmatpush3.bf16.msra.mxu0 %v1597_v50  ;;  %v1645_v50 = vpack.c.bf16 %v383_v39, %v382_v56  ;;  %v455_v28 = vld [vmem:[%s2926_s2 + $0x7b8] sm:$0xff]  ;;  %v1659_v31 = vpack.c.bf16 %v423_v27, %v422_v26  ;;  %v409_v39 = vld [vmem:[%s2926_s2 + $0x648] sm:$0xff]  ;;  %v428_v3 = vld [vmem:[%s2926_s2 + $0x6e0] sm:$0xff] }
  0xbb   :  { %1630 = vmatpush3.bf16.msra.mxu1 %v1629_v54  ;;  %1600 = vmatprep.subr.bf16.mxu0 %v1599_v57  ;;  %v1647_v54 = vpack.c.bf16 %v417_v41, %v416_v40  ;;  %v1679_v57 = vpack.c.bf16 %v449_v44, %v448_v43  ;;  %v407_v47 = vld [vmem:[%s2926_s2 + $0x638] sm:$0xff]  ;;  %v1691_v38 = vpack.c.bf16 %v455_v28, %v454_v25  ;;  %v440_v40 = vld [vmem:[%s2926_s2 + $0x740] sm:$0xff]  ;;  %v441_v43 = vld [vmem:[%s2926_s2 + $0x748] sm:$0xff] }
  0xbc   :  { %1632 = vmatprep.subr.bf16.mxu1 %v1631_v45  ;;  %v433_v45 = vld [vmem:[%s2926_s2 + $0x708] sm:$0xff]  ;;  %v439_v32 = vld [vmem:[%s2926_s2 + $0x738] sm:$0xff]  ;;  %v1661_v36 = vpack.c.bf16 %v407_v47, %v406_v35  ;;  %v426_v44 = vld [vmem:[%s2926_s2 + $0x6d0] sm:$0xff]  ;;  %v1697_v58 = vpack.c.bf16 %v441_v43, %v440_v40 }
  0xbd   :  { %v1693_v52 = vpack.c.bf16 %v439_v32, %v438_v53  ;;  %v443_v2 = vld [vmem:[%s2926_s2 + $0x758] sm:$0xff]  ;;  %v444_v18 = vld [vmem:[%s2926_s2 + $0x760] sm:$0xff]  ;;  %v445_v6 = vld [vmem:[%s2926_s2 + $0x768] sm:$0xff] }
  0xbe   :  { %1602 = vmatpush3.bf16.msra.mxu0 %v1601_v7  ;;  %v1681_v7 = vpack.c.bf16 %v433_v45, %v432_v60  ;;  %v410_v60 = vld [vmem:[%s2926_s2 + $0x650] sm:$0xff]  ;;  %v411_v45 = vld [vmem:[%s2926_s2 + $0x658] sm:$0xff] }
  0xbf   :  { %1634 = vmatpush3.bf16.msra.mxu1 %v1633_v9  ;;  %1604 = vmatprep.subr.bf16.mxu0 %v1603_v11  ;;  %v1651_v9 = vpack.c.bf16 %v419_v63, %v418_v62  ;;  %v402_v11 = vld [vmem:[%s2926_s2 + $0x610] sm:$0xff]  ;;  %v447_v25 = vld [vmem:[%s2926_s2 + $0x778] sm:$0xff] }
  0xc0   :  { %1636 = vmatprep.subr.bf16.mxu1 %v1635_v17  ;;  %v435_v17 = vld [vmem:[%s2926_s2 + $0x718] sm:$0xff]  ;;  %v1653_v21 = vpack.c.bf16 %v403_v13, %v402_v11  ;;  %v442_v62 = vld [vmem:[%s2926_s2 + $0x750] sm:$0xff]  ;;  %v1669_v11 = vpack.c.bf16 %v411_v45, %v410_v60 }
  0xc1   :  { %v1685_v10 = vpack.c.bf16 %v435_v17, %v434_v14  ;;  %v1701_v13 = vpack.c.bf16 %v443_v2, %v442_v62  ;;  %v413_v17 = vld [vmem:[%s2926_s2 + $0x668] sm:$0xff]  ;;  %v430_v20 = vld [vmem:[%s2926_s2 + $0x6f0] sm:$0xff] }
  0xc2   :  { %1606 = vmatpush3.bf16.msra.mxu0 %v1605_v23  ;;  %v405_v23 = vld [vmem:[%s2926_s2 + $0x628] sm:$0xff]  ;;  %v446_v27 = vld [vmem:[%s2926_s2 + $0x770] sm:$0xff] }
  0xc3   :  { %1638 = vmatpush3.bf16.msra.mxu1 %v1637_v12  ;;  %1608 = vmatprep.subr.bf16.mxu0 %v1607_v24  ;;  %v436_v12 = vld [vmem:[%s2926_s2 + $0x720] sm:$0xff]  ;;  %v437_v24 = vld [vmem:[%s2926_s2 + $0x728] sm:$0xff] }
  0xc4   :  { %1640 = vmatprep.subr.bf16.mxu1 %v1639_v29  ;;  %v1657_v29 = vpack.c.bf16 %v405_v23, %v404_v16  ;;  %v1689_v30 = vpack.c.bf16 %v437_v24, %v436_v12  ;;  %v1705_v23 = vpack.c.bf16 %v445_v6, %v444_v18  ;;  %v415_v24 = vld [vmem:[%s2926_s2 + $0x678] sm:$0xff] }
  0xc6   :  { %1610 = vmatpush3.bf16.msra.mxu0 %v1609_v55  ;;  %v425_v55 = vld [vmem:[%s2926_s2 + $0x6c8] sm:$0xff] }
  0xc7   :  { %1642 = vmatpush3.bf16.msra.mxu1 %v1641_v33  ;;  %1612 = vmatprep.subr.bf16.mxu0 %v1611_v34  ;;  %v456_v33 = vld [vmem:[%s2926_s2 + $0x7c0] sm:$0xff]  ;;  %v457_v34 = vld [vmem:[%s2926_s2 + $0x7c8] sm:$0xff]  ;;  %v1663_v56 = vpack.c.bf16 %v425_v55, %v424_v46 }
  0xc8   :  { %1644 = vmatprep.subr.bf16.mxu1 %v1643_v37  ;;  %v408_v37 = vld [vmem:[%s2926_s2 + $0x640] sm:$0xff]  ;;  %v1695_v41 = vpack.c.bf16 %v457_v34, %v456_v33 }
  0xca   :  { %1614 = vmatpush3.bf16.msra.mxu0 %v1613_v49  ;;  %v427_v49 = vld [vmem:[%s2926_s2 + $0x6d8] sm:$0xff] }
  0xcb   :  { %1646 = vmatpush3.bf16.msra.mxu1 %v1645_v50  ;;  %1648 = vmatprep.subr.bf16.mxu0 %v1647_v54  ;;  %v458_v50 = vld [vmem:[%s2926_s2 + $0x7d0] sm:$0xff]  ;;  %v459_v54 = vld [vmem:[%s2926_s2 + $0x7d8] sm:$0xff]  ;;  %v1667_v59 = vpack.c.bf16 %v427_v49, %v426_v44 }
  0xcc   :  { %1680 = vmatprep.subr.bf16.mxu1 %v1679_v57  ;;  %v1665_v57 = vpack.c.bf16 %v409_v39, %v408_v37  ;;  %v1699_v63 = vpack.c.bf16 %v459_v54, %v458_v50 }
  0xcd   :  { %1136 = vmatmul.mubr.msk.f32.vlgmr.msra.gmra.mrb[8].mxu0 %vm2237_vm3, %v1747_v0  ;;  %vm2972_vm3 = vnez %v2945_v42 }
  0xce   :  { %1140 = vmatmul.mubr.msk.f32.vlgmr.msra.gmra.mrb[8].mxu1 %vm2256_vm7, %v1747_v0  ;;  %1137 = vmatprep.mubr.msk.f32.mxu0 %vm2275_vm10, %v1747_v0  ;;  %vm2973_vm7 = vnez %v2950_v51  ;;  %vm2974_vm10 = vnez %v2954_v61 }
  0xcf   :  { %1141 = vmatprep.mubr.msk.f32.mxu1 %vm2296_vm13, %v1747_v0  ;;  %1650 = vmatpush3.bf16.msra.mxu0 %v1649_v5  ;;  %v429_v5 = vld [vmem:[%s2926_s2 + $0x6e8] sm:$0xff]  ;;  %vm2975_vm13 = vnez %v2956_v1 }
  0xd0   :  { %1682 = vmatpush3.bf16.msra.mxu1 %v1681_v7  ;;  %1652 = vmatprep.subr.bf16.mxu0 %v1651_v9  ;;  %v460_v7 = vld [vmem:[%s2926_s2 + $0x7e0] sm:$0xff]  ;;  %v461_v9 = vld [vmem:[%s2926_s2 + $0x7e8] sm:$0xff]  ;;  %v1671_v14 = vpack.c.bf16 %v429_v5, %v428_v3 }
  0xd1   :  { %1138 = vmatmul.mubr.msk.f32.gmra.mrb[10].mxu0 %vm2306_vm15, %v1747_v0  ;;  %1684 = vmatprep.subr.bf16.mxu1 %v1683_v15  ;;  %v412_v15 = vld [vmem:[%s2926_s2 + $0x660] sm:$0xff]  ;;  %v1703_v19 = vpack.c.bf16 %v461_v9, %v460_v7  ;;  %vm2976_vm15 = vnez %v2960_v4 }
  0xd2   :  { %1142 = vmatmul.mubr.msk.f32.gmra.mrb[10].mxu1 %vm2324_vm1, %v1747_v0  ;;  %1143 = vmatprep.mubr.msk.f32.mxu0 %vm2338_vm5, %v1747_v0  ;;  %v1673_v16 = vpack.c.bf16 %v413_v17, %v412_v15  ;;  %vm1068_vm1 = vcmask 261120  }
  0xd3   :  { %1654 = vmatpush3.bf16.msra.mxu0 %v1653_v21  ;;  %1147 = vmatprep.mubr.msk.f32.mxu1 %vm2354_vm9, %v1747_v0  ;;  %v431_v21 = vld [vmem:[%s2926_s2 + $0x6f8] sm:$0xff] }
  0xd4   :  { %1686 = vmatpush3.bf16.msra.mxu1 %v1685_v10  ;;  %1656 = vmatprep.subr.bf16.mxu0 %v1655_v8  ;;  %v462_v10 = vld [vmem:[%s2926_s2 + $0x7f0] sm:$0xff]  ;;  %v463_v8 = vld [vmem:[%s2926_s2 + $0x7f8] sm:$0xff]  ;;  %v1675_v12 = vpack.c.bf16 %v431_v21, %v430_v20 }
  0xd5   :  { %1688 = vmatprep.subr.bf16.mxu1 %v1687_v22  ;;  %v414_v22 = vld [vmem:[%s2926_s2 + $0x670] sm:$0xff]  ;;  %v1707_v26 = vpack.c.bf16 %v463_v8, %v462_v10 }
  0xd6   :  { %v1677_v28 = vpack.c.bf16 %v415_v24, %v414_v22 }
  0xd7   :  { %1658 = vmatpush3.bf16.msra.mxu0 %v1657_v29  ;;  %v1709_v29 = vpack.c.bf16 %v447_v25, %v446_v27 }
  0xd8   :  { %1690 = vmatpush3.bf16.msra.mxu1 %v1689_v30  ;;  %1660 = vmatprep.subr.bf16.mxu0 %v1659_v31 }
  0xd9   :  { %1692 = vmatprep.subr.bf16.mxu1 %v1691_v38 }
  0xdb   :  { %1662 = vmatpush3.bf16.msra.mxu0 %v1661_v36 }
  0xdc   :  { %1694 = vmatpush3.bf16.msra.mxu1 %v1693_v52  ;;  %1664 = vmatprep.subr.bf16.mxu0 %v1663_v56 }
  0xdd   :  { %1696 = vmatprep.subr.bf16.mxu1 %v1695_v41 }
  0xdf   :  { %1666 = vmatpush3.bf16.msra.mxu0 %v1665_v57 }
  0xe0   :  { %1698 = vmatpush3.bf16.msra.mxu1 %v1697_v58  ;;  %1668 = vmatprep.subr.bf16.mxu0 %v1667_v59 }
  0xe1   :  { %1700 = vmatprep.subr.bf16.mxu1 %v1699_v63 }
  0xe3   :  { %1670 = vmatpush3.bf16.msra.mxu0 %v1669_v11 }
  0xe4   :  { %1702 = vmatpush3.bf16.msra.mxu1 %v1701_v13  ;;  %1672 = vmatprep.subr.bf16.mxu0 %v1671_v14 }
  0xe5   :  { %1704 = vmatprep.subr.bf16.mxu1 %v1703_v19 }
  0xe7   :  { %1674 = vmatpush3.bf16.msra.mxu0 %v1673_v16  ;;  %v1064_v16 = vld [vmem:[%s2924_s0] sm:$0xff] }
  0xe8   :  { %1706 = vmatpush3.bf16.msra.mxu1 %v1705_v23  ;;  %1676 = vmatprep.subr.bf16.mxu0 %v1675_v12 }
  0xe9   :  { %1708 = vmatprep.subr.bf16.mxu1 %v1707_v26 }
  0xeb   :  { %1678 = vmatpush3.bf16.msra.mxu0 %v1677_v28 }
  0xec   :  { %1710 = vmatpush3.bf16.msra.mxu1 %v1709_v29  ;;  %v1065_v29 = vld [vmem:[%s2924_s0 + $0x8] sm:$0xff] }
  0xee   :  { %1144 = vmatmul.mubr.msk.f32.vlgmr.msra.gmra.mrb[12].mxu0 %vm2972_vm3, %v1747_v0 }
  0xef   :  { %1148 = vmatmul.mubr.msk.f32.vlgmr.msra.gmra.mrb[12].mxu1 %vm2386_vm4, %v1747_v0  ;;  %1145 = vmatprep.mubr.msk.f32.mxu0 %vm2973_vm7, %v1747_v0 }
  0xf0   :  { %1149 = vmatprep.mubr.msk.f32.mxu1 %vm2974_vm10, %v1747_v0 }
  0xf2   :  { %1146 = vmatmul.mubr.msk.f32.gmra.mrb[14].mxu0 %vm2975_vm13, %v1747_v0 }
  0xf3   :  { %1150 = vmatmul.mubr.msk.f32.gmra.mrb[14].mxu1 %vm2976_vm15, %v1747_v0 }
 0x15f   :  { %v1183_v42 = vpop.f32.mrb[0].mxu0 }
 0x160   :  { %v1221_v30 = vpop.f32.mrb[0].mxu1  ;;  %v1184_v48 = vpop.f32.mrb[1].mxu0 }
 0x161   :  { %v1185_v31 = vadd.f32 %v1184_v48, %v1183_v42  ;;  %v1222_v35 = vpop.f32.mrb[1].mxu1 }
 0x162   :  { %v1223_v47 = vadd.f32 %v1222_v35, %v1221_v30 }
 0x163   :  { %v1186_v51 = vpop.f32.mrb[2].mxu0 }
 0x164   :  { %v606_v53 = vadd.f32 %v1223_v47, %v1185_v31  ;;  %v1224_v38 = vpop.f32.mrb[2].mxu1  ;;  %v1187_v32 = vpop.f32.mrb[3].mxu0 }
 0x165   :  { %v1188_v61 = vadd.f32 %v1187_v32, %v1186_v51  ;;  %v1225_v46 = vpop.f32.mrb[3].mxu1 }
 0x166   :  { %v1226_v55 = vadd.f32 %v1225_v46, %v1224_v38 }
 0x168   :  { %v611_v33 = vadd.f32 %v1226_v55, %v1188_v61 }
 0x17f   :  { %v1259_v1 = vpop.f32.mrb[4].mxu0 }
 0x180   :  { %v1297_v34 = vpop.f32.mrb[4].mxu1  ;;  %v1260_v36 = vpop.f32.mrb[5].mxu0 }
 0x181   :  { %v1261_v52 = vadd.f32 %v1260_v36, %v1259_v1  ;;  %v1298_v4 = vpop.f32.mrb[5].mxu1 }
 0x182   :  { %v1299_v0 = vadd.f32 %v1298_v4, %v1297_v34 }
 0x183   :  { %v681_v56 = vadd.f32 %v1261_v52, %v606_v53  ;;  %v1262_v37 = vpop.f32.mrb[6].mxu0 }
 0x184   :  { %v1300_v39 = vpop.f32.mrb[6].mxu1  ;;  %v1263_v40 = vpop.f32.mrb[7].mxu0 }
 0x185   :  { %v756_v41 = vadd.f32 %v1299_v0, %v681_v56  ;;  %v1264_v43 = vadd.f32 %v1263_v40, %v1262_v37  ;;  %v1301_v44 = vpop.f32.mrb[7].mxu1 }
 0x186   :  { %v1302_v49 = vadd.f32 %v1301_v44, %v1300_v39 }
 0x187   :  { %v686_v50 = vadd.f32 %v1264_v43, %v611_v33 }
 0x189   :  { %v761_v54 = vadd.f32 %v1302_v49, %v686_v50 }
 0x1a0   :  { %v1335_v57 = vpop.f32.mrb[8].mxu0 }
 0x1a1   :  { %v1373_v58 = vpop.f32.mrb[8].mxu1  ;;  %v1336_v59 = vpop.f32.mrb[9].mxu0 }
 0x1a2   :  { %v1337_v60 = vadd.f32 %v1336_v59, %v1335_v57  ;;  %v1374_v45 = vpop.f32.mrb[9].mxu1 }
 0x1a3   :  { %v1375_v62 = vadd.f32 %v1374_v45, %v1373_v58 }
 0x1a4   :  { %v831_v63 = vadd.f32 %v1337_v60, %v756_v41  ;;  %v1338_v2 = vpop.f32.mrb[10].mxu0 }
 0x1a5   :  { %v1376_v3 = vpop.f32.mrb[10].mxu1  ;;  %v1339_v5 = vpop.f32.mrb[11].mxu0 }
 0x1a6   :  { %v906_v7 = vadd.f32 %v1375_v62, %v831_v63  ;;  %v1340_v9 = vadd.f32 %v1339_v5, %v1338_v2  ;;  %v1377_v11 = vpop.f32.mrb[11].mxu1 }
 0x1a7   :  { %v1378_v13 = vadd.f32 %v1377_v11, %v1376_v3 }
 0x1a8   :  { %v836_v14 = vadd.f32 %v1340_v9, %v761_v54 }
 0x1aa   :  { %v911_v15 = vadd.f32 %v1378_v13, %v836_v14 }
 0x1c1   :  { %v1411_v17 = vpop.f32.mrb[12].mxu0 }
 0x1c2   :  { %v1449_v18 = vpop.f32.mrb[12].mxu1  ;;  %v1412_v19 = vpop.f32.mrb[13].mxu0 }
 0x1c3   :  { %v1413_v6 = vadd.f32 %v1412_v19, %v1411_v17  ;;  %v1450_v20 = vpop.f32.mrb[13].mxu1 }
 0x1c4   :  { %v1451_v21 = vadd.f32 %v1450_v20, %v1449_v18 }
 0x1c5   :  { %v981_v10 = vadd.f32 %v1413_v6, %v906_v7  ;;  %v1414_v8 = vpop.f32.mrb[14].mxu0 }
 0x1c6   :  { %v1452_v23 = vpop.f32.mrb[14].mxu1  ;;  %v1415_v12 = vpop.f32.mrb[15].mxu0 }
 0x1c7   :  { %v1056_v22 = vadd.f32 %v1451_v21, %v981_v10  ;;  %v1416_v24 = vadd.f32 %v1415_v12, %v1414_v8  ;;  %v1453_v26 = vpop.f32.mrb[15].mxu1 }
 0x1c8   :  { %v1454_v27 = vadd.f32 %v1453_v26, %v1452_v23 }
 0x1c9   :  { %v1066_v25 = vadd.f32 %v1064_v16, %v1056_v22  ;;  %v986_v28 = vadd.f32 %v1416_v24, %v911_v15 }
 0x1cb   :  { %1069 = vst.msk [vmem:[#allocation2] sm:$0xff] %vm1068_vm1, %v1066_v25  ;;  %v1061_v42 = vadd.f32 %v1454_v27, %v986_v28 }
 0x1cd   :  { %v1067_v30 = vadd.f32 %v1065_v29, %v1061_v42 }
 0x1cf   :  { %1070 = vst.msk [vmem:[#allocation2 + $0x8] sm:$0xff] %vm1068_vm1, %v1067_v30 }
 0x1d0   :  { %1732 = shalt.err (!%p1729_p4)
}
 0x1d1   :  { %s1733_s4 = scalar_lea.hbm %s2927_s3, 256 }
 0x1d2   :  { %p1734_p5 = scmp.ne.s32.totalorder %s2927_s3, %s1733_s4  ;;  %p1737_p6 = scmp.lt.u32.totalorder %s1733_s4, %s2927_s3 }
 0x1d4   :  { %p1739_p7 = pnand %p1737_p6, %p1734_p5 }
 0x1d6   :  { %1742 = shalt.err (!%p1739_p7)
}
 0x1d7   :  { %s1749_s8 = smov 128   ;;  %s1750_s9 = smov 8  }
 0x1d8   :  { %1082 = dma.vmem_to_hbm [thread:$0]  %s1077_s27, 256, %s2927_s3, [#allocation3], %s1749_s8, %s1749_s8, %s1750_s9  }
 0x1d9   :  { %1743 = dma.done.wait [#allocation3], 256  }
 0x1da   :  { %1744 = vsyncadd [#allocation3], 4294967040 }
 0x1db   :  { %1086 = vsyncpa [#allocation3], 1 }

</bundles_post_ra>
